<compile_context>
chip_gen: v7x
topology: tpu7x:2x2x1
jax: 0.10.0
libtpu: 0.0.40
codegen_flags: <defaults>
</compile_context>

<pallas_src>
import math

import numpy as np
import jax
import jax.numpy as jnp
from jax.experimental import pallas as pl
from jax.experimental.pallas import tpu as pltpu

# ---------------- configuration ----------------------------------------------
BATCH    = 2
SEQ_LEN  = 8                                  # T
D_MODEL  = 32
K_FILT   = 4
VOCAB    = 16
D_OUT    = VOCAB                              # d_out defaults to vocab_size
CP       = K_FILT * (K_FILT + 1) // 2         # 10
LANE     = 128                                # lane-tile width for fused sections
DTYPE    = jnp.bfloat16


# ---------------- spectral filter initialization (host-side glue) ------------
def get_hankel(seq_len: int) -> np.ndarray:
    e = np.arange(1, seq_len + 1, dtype=np.float32)
    ipj = e[:, None] + e[None, :]
    return 2.0 / (ipj ** 3 - ipj)


def get_spectral_filters(seq_len: int, k: int) -> np.ndarray:
    Z = get_hankel(seq_len)
    sigma, phi = np.linalg.eigh(Z)                     # ascending, like torch
    sigma_k = np.clip(sigma[-k:], 1e-9, None)
    phi_k = phi[:, -k:] * sigma_k ** 0.25
    return phi_k.astype(np.float32)                    # (seq_len, k)


# ---------------- Pallas kernel -----------------------------------------------
def spectron_kernel(x_ref, w_ref, b_ref, ltri_ref, woo_ref, o_ref):
    """One grid step = one batch element: (T, D) -> (T, 128) lane-dense logits."""
    f32 = jnp.float32
    x = x_ref[...]                                                    # (T, D) bf16

    # fused input matmul (bf16 x bf16 -> f32 acc): [Q | Zi | Zj | residual-out]
    p = jnp.dot(x, w_ref[...], preferred_element_type=f32) + b_ref[...]  # (T, 4*LANE)

    q    = p[:, 0 * LANE:1 * LANE]      # cols 0..CP-1 meaningful
    zi   = p[:, 1 * LANE:2 * LANE]
    zj   = p[:, 2 * LANE:3 * LANE]
    base = p[:, 3 * LANE:4 * LANE]      # x@Wout^T + folded bias (full lane tile)

    # symmetric outer (compressed; sqrt(2) off-diag folded as 2^0.25 per factor)
    z = (zi * zj).astype(jnp.bfloat16)  # f32 mul on VPU, bf16 only at MXU boundary

    # decay + causal cumsum via per-sequence (T,T) lower-tri, decay folded in
    # TODO(synk): for long sequences replace with a chunked (Tc,Tc) scan carrying a
    # running prefix-sum accumulator in VMEM scratch over an "arbitrary" time axis.
    h = jnp.dot(ltri_ref[...], z, preferred_element_type=f32)         # (T, LANE)

    # gate, project through fused (o_proj @ out_proj), add residual-out block
    y = (q * h).astype(jnp.bfloat16)
    logits = base + jnp.dot(y, woo_ref[...], preferred_element_type=f32)  # (T, LANE)
    o_ref[...] = logits.astype(o_ref.dtype)


# ---------------- host-side (one-time) weight folding -------------------------
def _np32(a):
    return np.asarray(jax.device_get(a)).astype(np.float32)


def fold_params(params):
    assert CP <= LANE and D_OUT <= LANE, "fused sections must each fit one lane tile"

    wpre_t = _np32(params['w_pre']).T              # (D, T)
    bpre   = _np32(params['b_pre'])                # (T,)
    qf     = _np32(params['q_filters'])            # (T, k)
    kf     = _np32(params['k_filters'])            # (T, k)
    wq_t   = _np32(params['w_q']).T                # (k, cp)
    bq     = _np32(params['b_q'])                  # (cp,)
    wo_t   = _np32(params['w_o']).T                # (cp, D)
    bo     = _np32(params['b_o'])                  # (D,)
    wout_t = _np32(params['w_out']).T              # (D, d_out)
    bout   = _np32(params['b_out'])                # (d_out,)
    decay  = _np32(params['decay'])                # (T,)

    # Q path folded: x @ Wpre^T @ Qf @ Wq^T + folded bias
    a_q   = wpre_t @ qf @ wq_t                     # (D, cp)
    b_q_f = bpre @ qf @ wq_t + bq                  # (cp,)

    # K path + symmetric-outer selection; sqrt(scale) = 2^0.25 on each factor
    a_k   = wpre_t @ kf                            # (D, k)
    b_k_f = bpre @ kf                              # (k,)
    iu0, iu1 = np.triu_indices(K_FILT)
    sq = np.where(iu0 == iu1, 1.0, 2.0 ** 0.25).astype(np.float32)
    w_zi, b_zi = a_k[:, iu0] * sq[None, :], b_k_f[iu0] * sq
    w_zj, b_zj = a_k[:, iu1] * sq[None, :], b_k_f[iu1] * sq

    # o_proj folded through out_proj; residual path uses Wout^T directly
    w_oo   = wo_t @ wout_t                         # (cp, d_out)
    b_tail = bo @ wout_t + bout                    # (d_out,)

    # lane-tile-aligned fused slabs
    w_big = np.zeros((D_MODEL, 4 * LANE), np.float32)
    w_big[:, 0:CP]                      = a_q
    w_big[:, LANE:LANE + CP]            = w_zi
    w_big[:, 2 * LANE:2 * LANE + CP]    = w_zj
    w_big[:, 3 * LANE:3 * LANE + D_OUT] = wout_t

    b_big = np.zeros((1, 4 * LANE), np.float32)
    b_big[0, 0:CP]                      = b_q_f
    b_big[0, LANE:LANE + CP]            = b_zi
    b_big[0, 2 * LANE:2 * LANE + CP]    = b_zj
    b_big[0, 3 * LANE:3 * LANE + D_OUT] = b_tail

    # per-sequence lower-triangular causal matrix with decay folded column-wise
    ltri = np.tril(np.ones((SEQ_LEN, SEQ_LEN), np.float32)) * decay[None, :]

    # w_oo padded to a full (128, 128) tile -> lane-dense output store
    w_oo_pad = np.zeros((LANE, LANE), np.float32)
    w_oo_pad[:CP, :D_OUT] = w_oo

    return dict(
        w_big=jnp.asarray(w_big, jnp.bfloat16),    # bf16 MXU operands
        b_big=jnp.asarray(b_big, jnp.float32),     # f32 bias added post-accumulate
        ltri=jnp.asarray(ltri, jnp.bfloat16),
        w_oo=jnp.asarray(w_oo_pad, jnp.bfloat16),
    )


# ---------------- wrapper ------------------------------------------------------
def make_forward(params):
    """Fold weights once; return a jitted forward(tokens) -> (B, T, D_OUT)."""
    folded = fold_params(params)
    emb = params['embedding']
    w_big, b_big, ltri, w_oo = (folded['w_big'], folded['b_big'],
                                folded['ltri'], folded['w_oo'])

    @jax.jit
    def forward(tokens):
        B, T = tokens.shape
        # TODO(synk): embedding gather left to XLA (no clean Pallas gather here).
        x = jnp.take(emb, tokens, axis=0)                         # (B, T, D) bf16

        out = pl.pallas_call(
            spectron_kernel,
            out_shape=jax.ShapeDtypeStruct((B, T, LANE), DTYPE),  # lane-dense store
            grid=(B,),
            in_specs=[
                pl.BlockSpec((None, T, D_MODEL), lambda b: (b, 0, 0)),
                # constant index_maps -> slabs stay VMEM-resident across grid steps
                pl.BlockSpec((D_MODEL, 4 * LANE), lambda b: (0, 0)),
                pl.BlockSpec((1, 4 * LANE), lambda b: (0, 0)),
                pl.BlockSpec((T, T), lambda b: (0, 0)),
                pl.BlockSpec((LANE, LANE), lambda b: (0, 0)),
            ],
            out_specs=pl.BlockSpec((None, T, LANE), lambda b: (b, 0, 0)),
            compiler_params=pltpu.CompilerParams(
                dimension_semantics=("parallel",)),               # both TCs on v7x
        )(x, w_big, b_big, ltri, w_oo)

        return out[..., :D_OUT]                                   # drop lane padding

    return forward


# ---------------- pure-JAX reference (unfused, mirrors the torch module) ------
def reference_forward(tokens, P):
    f32 = jnp.float32
    x = jnp.take(P['embedding'], tokens, axis=0).astype(f32)            # (B,T,D)
    xp = x @ P['w_pre'].T.astype(f32) + P['b_pre'].astype(f32)          # pre_proj
    Q = (xp @ P['q_filters'].astype(f32)) @ P['w_q'].T.astype(f32) \
        + P['b_q'].astype(f32)
    K = xp @ P['k_filters'].astype(f32)                                 # (B,T,k)
    iu0, iu1 = np.triu_indices(K_FILT)
    outer = K[..., :, None] * K[..., None, :]
    Z = outer[..., iu0, iu1]
    scale = jnp.asarray(np.where(iu0 == iu1, 1.0, math.sqrt(2.0)), f32)
    Z = Z * scale
    Z = Z * P['decay'].astype(f32)[None, :, None]
    H = jnp.cumsum(Z, axis=1)
    Y = Q * H
    attn = Y @ P['w_o'].T.astype(f32) + P['b_o'].astype(f32)
    out = x + attn
    logits = out @ P['w_out'].T.astype(f32) + P['b_out'].astype(f32)
    return logits.astype(DTYPE)


# ---------------- deterministic parameter construction ------------------------
def init_params(key):
    ks = jax.random.split(key, 9)
    filt = jnp.asarray(get_spectral_filters(SEQ_LEN, K_FILT), DTYPE)    # (T, k)

    def linear(kw, kb, fan_in, fan_out):
        bound = 1.0 / math.sqrt(fan_in)
        w = jax.random.uniform(kw, (fan_out, fan_in), jnp.float32, -bound, bound)
        b = jax.random.uniform(kb, (fan_out,), jnp.float32, -bound, bound)
        return w.astype(DTYPE), b.astype(DTYPE)

    w_pre, b_pre = linear(ks[1], ks[2], D_MODEL, SEQ_LEN)   # pre_proj
    w_q,   b_q   = linear(ks[3], ks[4], K_FILT, CP)         # q_proj
    w_o,   b_o   = linear(ks[5], ks[6], CP, D_MODEL)        # o_proj
    w_out, b_out = linear(ks[7], ks[8], D_MODEL, D_OUT)     # out_proj

    return dict(
        embedding=jax.random.normal(ks[0], (VOCAB, D_MODEL), jnp.float32).astype(DTYPE),
        w_pre=w_pre, b_pre=b_pre,
        q_filters=filt, k_filters=filt,
        w_q=w_q, b_q=b_q,
        w_o=w_o, b_o=b_o,
        decay=jnp.ones((SEQ_LEN,), DTYPE),
        w_out=w_out, b_out=b_out,
    )


# ---------------- main ---------------------------------------------------------
if __name__ == "__main__":
    key = jax.random.PRNGKey(0)
    kparam, ktok = jax.random.split(key)
    params = init_params(kparam)

    tokens = jax.random.randint(ktok, (BATCH, SEQ_LEN), 0, VOCAB, dtype=jnp.int32)

    forward = make_forward(params)                 # folds weights once, jits wrapper
    out = jax.block_until_ready(forward(tokens))
    assert out.shape == (BATCH, SEQ_LEN, D_OUT)
    assert out.dtype == DTYPE

    ref = reference_forward(tokens, params)
    out_f32 = np.asarray(jnp.asarray(out, jnp.float32))
    ref_f32 = np.asarray(jnp.asarray(ref, jnp.float32))
    np.testing.assert_allclose(out_f32, ref_f32, rtol=3e-2, atol=3e-2)

    print("KERNEL_OK")
</pallas_src>

<mosaic_0001>
module attributes {stable_mosaic.version = 11 : i64} {
  func.func @spectron_kernel(%arg0: i32, %arg1: memref<1x8x32xbf16, #tpu.memory_space<vmem>>, %arg2: memref<32x512xbf16, #tpu.memory_space<vmem>>, %arg3: memref<1x512xf32, #tpu.memory_space<vmem>>, %arg4: memref<8x8xbf16, #tpu.memory_space<vmem>>, %arg5: memref<128x128xbf16, #tpu.memory_space<vmem>>, %arg6: memref<1x8x128xbf16, #tpu.memory_space<vmem>>) attributes {dimension_semantics = [#tpu.dimension_semantics<parallel>], iteration_bounds = array<i64: 2>, scalar_prefetch = 0 : i64, scratch_operands = 0 : i64, tpu.core_type = #tpu.core_type<tc>, window_params = [{transform_indices = @transform_0, window_bounds = array<i64: 1, 8, 32>}, {pipeline_mode = #tpu.pipeline_mode<synchronous>, transform_indices = @transform_1, window_bounds = array<i64: 32, 512>}, {pipeline_mode = #tpu.pipeline_mode<synchronous>, transform_indices = @transform_2, window_bounds = array<i64: 1, 512>}, {pipeline_mode = #tpu.pipeline_mode<synchronous>, transform_indices = @transform_3, window_bounds = array<i64: 8, 8>}, {pipeline_mode = #tpu.pipeline_mode<synchronous>, transform_indices = @transform_4, window_bounds = array<i64: 128, 128>}, {transform_indices = @transform_5, window_bounds = array<i64: 1, 8, 128>}]} {
    %c0 = arith.constant 0 : index
    %c0_0 = arith.constant 0 : index
    %c0_1 = arith.constant 0 : index
    %0 = vector.load %arg1[%c0, %c0_0, %c0_1] : memref<1x8x32xbf16, #tpu.memory_space<vmem>>, vector<1x8x32xbf16>
    %1 = vector.shape_cast %0 : vector<1x8x32xbf16> to vector<8x32xbf16>
    %c0_2 = arith.constant 0 : index
    %c0_3 = arith.constant 0 : index
    %2 = vector.load %arg2[%c0_2, %c0_3] : memref<32x512xbf16, #tpu.memory_space<vmem>>, vector<32x512xbf16>
    %cst = arith.constant dense<0.000000e+00> : vector<8x512xf32>
    %3 = tpu.matmul %1, %2, %cst {dimension_numbers = #tpu.dot_dimension_numbers<[1], [0], [0], [1], [0, 0, 1, 1], [], []>} : vector<8x32xbf16>, vector<32x512xbf16>, vector<8x512xf32> -> vector<8x512xf32>
    %c0_4 = arith.constant 0 : index
    %c0_5 = arith.constant 0 : index
    %4 = vector.load %arg3[%c0_4, %c0_5] : memref<1x512xf32, #tpu.memory_space<vmem>>, vector<1x512xf32>
    %5 = vector.broadcast %4 : vector<1x512xf32> to vector<8x512xf32>
    %6 = arith.addf %3, %5 : vector<8x512xf32>
    %7 = vector.extract_strided_slice %6 {offsets = [0, 0], sizes = [8, 128], strides = [1, 1]} : vector<8x512xf32> to vector<8x128xf32>
    %8 = vector.extract_strided_slice %6 {offsets = [0, 128], sizes = [8, 128], strides = [1, 1]} : vector<8x512xf32> to vector<8x128xf32>
    %9 = vector.extract_strided_slice %6 {offsets = [0, 256], sizes = [8, 128], strides = [1, 1]} : vector<8x512xf32> to vector<8x128xf32>
    %10 = vector.extract_strided_slice %6 {offsets = [0, 384], sizes = [8, 128], strides = [1, 1]} : vector<8x512xf32> to vector<8x128xf32>
    %11 = arith.mulf %8, %9 : vector<8x128xf32>
    %12 = arith.truncf %11 : vector<8x128xf32> to vector<8x128xbf16>
    %c0_6 = arith.constant 0 : index
    %c0_7 = arith.constant 0 : index
    %13 = vector.load %arg4[%c0_6, %c0_7] : memref<8x8xbf16, #tpu.memory_space<vmem>>, vector<8x8xbf16>
    %cst_8 = arith.constant dense<0.000000e+00> : vector<8x128xf32>
    %14 = tpu.matmul %13, %12, %cst_8 {dimension_numbers = #tpu.dot_dimension_numbers<[1], [0], [0], [1], [0, 0, 1, 1], [], []>} : vector<8x8xbf16>, vector<8x128xbf16>, vector<8x128xf32> -> vector<8x128xf32>
    %15 = arith.mulf %7, %14 : vector<8x128xf32>
    %16 = arith.truncf %15 : vector<8x128xf32> to vector<8x128xbf16>
    %c0_9 = arith.constant 0 : index
    %c0_10 = arith.constant 0 : index
    %17 = vector.load %arg5[%c0_9, %c0_10] : memref<128x128xbf16, #tpu.memory_space<vmem>>, vector<128x128xbf16>
    %cst_11 = arith.constant dense<0.000000e+00> : vector<8x128xf32>
    %18 = tpu.matmul %16, %17, %cst_11 {dimension_numbers = #tpu.dot_dimension_numbers<[1], [0], [0], [1], [0, 0, 1, 1], [], []>} : vector<8x128xbf16>, vector<128x128xbf16>, vector<8x128xf32> -> vector<8x128xf32>
    %19 = arith.addf %10, %18 : vector<8x128xf32>
    %20 = arith.truncf %19 : vector<8x128xf32> to vector<8x128xbf16>
    %c0_12 = arith.constant 0 : index
    %c0_13 = arith.constant 0 : index
    %c0_14 = arith.constant 0 : index
    %21 = vector.load %arg6[%c0_12, %c0_13, %c0_14] : memref<1x8x128xbf16, #tpu.memory_space<vmem>>, vector<1x8x128xbf16>
    %22 = vector.shape_cast %21 : vector<1x8x128xbf16> to vector<8x128xbf16>
    %23 = vector.shape_cast %20 : vector<8x128xbf16> to vector<1x8x128xbf16>
    tpu.vector_store %arg6[%c0_12, %c0_13, %c0_14], %23 {strides = array<i32>} : memref<1x8x128xbf16, #tpu.memory_space<vmem>>, vector<1x8x128xbf16>,
    return
  }
  func.func @transform_0(%arg0: i32) -> (i32, i32, i32) {
    %c0_i32 = arith.constant 0 : i32
    %c0_i32_0 = arith.constant 0 : i32
    %c0_i32_1 = arith.constant 0 : i32
    return %arg0, %c0_i32, %c0_i32_0 : i32, i32, i32
  }
  func.func @transform_1(%arg0: i32) -> (i32, i32) {
    %c0_i32 = arith.constant 0 : i32
    %c0_i32_0 = arith.constant 0 : i32
    %c0_i32_1 = arith.constant 0 : i32
    return %c0_i32, %c0_i32_0 : i32, i32
  }
  func.func @transform_2(%arg0: i32) -> (i32, i32) {
    %c0_i32 = arith.constant 0 : i32
    %c0_i32_0 = arith.constant 0 : i32
    %c0_i32_1 = arith.constant 0 : i32
    return %c0_i32, %c0_i32_0 : i32, i32
  }
  func.func @transform_3(%arg0: i32) -> (i32, i32) {
    %c0_i32 = arith.constant 0 : i32
    %c0_i32_0 = arith.constant 0 : i32
    %c0_i32_1 = arith.constant 0 : i32
    return %c0_i32, %c0_i32_0 : i32, i32
  }
  func.func @transform_4(%arg0: i32) -> (i32, i32) {
    %c0_i32 = arith.constant 0 : i32
    %c0_i32_0 = arith.constant 0 : i32
    %c0_i32_1 = arith.constant 0 : i32
    return %c0_i32, %c0_i32_0 : i32, i32
  }
  func.func @transform_5(%arg0: i32) -> (i32, i32, i32) {
    %c0_i32 = arith.constant 0 : i32
    %c0_i32_0 = arith.constant 0 : i32
    %c0_i32_1 = arith.constant 0 : i32
    return %arg0, %c0_i32, %c0_i32_0 : i32, i32, i32
  }
}

</mosaic_0001>

<bundles_post_ra>
// kernel: forward.1
= control target key start
LH: loop header
LB: loop body
LE: loop exit
PB: predicated region body
PF: predicated region fallthrough
CT: control target
= control target key end

     0   :  { %10 = vsyncpa [#allocation3], 0  ;;  %s991_s0 = inlined_call_operand.vmem [shape: bf16[2,8,32], index: 0, kind: input, shape index: {}]   ;;  %s992_s1 = inlined_call_operand.vmem [shape: bf16[32,512], index: 1, kind: input, shape index: {}]   ;;  %s993_s2 = inlined_call_operand.vmem [shape: f32[1,512], index: 2, kind: input, shape index: {}]   ;;  %s994_s3 = inlined_call_operand.vmem [shape: bf16[8,8], index: 3, kind: input, shape index: {}]   ;;  %s995_s4 = inlined_call_operand.vmem [shape: bf16[128,128], index: 4, kind: input, shape index: {}]   ;;  %s996_s5 = inlined_call_operand.hbm [shape: bf16[2,8,128], index: 5, kind: output, shape index: {}]  }
   0x1   :  { %12 = vsyncpa [#allocation3 + $0x1], 0  ;;  %s837_s18 = smov 0   ;;  %s839_s19 = smov 0  }
   0x2   :  { %s841_s20 = smov 0   ;;  %s843_s21 = smov 0  }
   0x3 LB: > { %s858_s22 = sadd.s32 4294967295, %s801_s21   ;;  %s611_s23 = sadd.s32 4294967294, %s801_s21   ;;  %s801_s21 = sphi %s843_s21, %s1002_s21   ;;  %s797_s20 = sphi %s841_s20, %s1001_s20   ;;  %s793_s19 = sphi %s839_s19, %s1000_s19   ;;  %s789_s18 = sphi %s837_s18, %s999_s18  }
   0x4   : > { %s862_s24 = sadd.s32 1, %s801_s21   ;;  %s135_s25 = sadd.s32 1, %s797_s20 }
   0x5   : > { %s132_s26 = ssub.s32 %s801_s21, %s862_s24  ;;  %p145_p0 = scmp.ne.s32.totalorder %s797_s20, %s793_s19 }
   0x6   : > { %p133_p1 = scmp.eq.s32.totalorder %s132_s26, 0  ;;  %p146_p2 = scmp.eq.s32.totalorder %s858_s22, 1 }
   0x7   : > { %p151_p3 = scmp.ne.s32.totalorder %s793_s19, %s789_s18  ;;  %p152_p4 = scmp.eq.s32.totalorder %s611_s23, 1 }
   0x8   : > { %s873_s27 = scalar_select %p133_p1, %s797_s20, %s135_s25  }
   0x9   : > { %p875_p5 = por %p146_p2, %p145_p0  ;;  %p879_p6 = por %p152_p4, %p151_p3 }
   0xa   : > { %p614_p7 = scmp.ge.s32.totalorder %s801_s21, 1  ;;  %p189_p8 = scmp.lt.s32.totalorder %s801_s21, 3 }
   0xc   : > { %p190_p9 = pnand %p614_p7, %p189_p8 }
   0xd   : > { %v719_v0 = vld [vmem:[%s992_s1 + $0x4] ss:$16 sps:$4 sm:$0xff] (!%p190_p9)   ;;  %p216_p10 = scmp.lt.s32.totalorder (!%p190_p9), %s858_s22, 1  ;;  %v721_v1 = vld [vmem:[%s992_s1] ss:$16 sps:$4 sm:$0xff] (!%p190_p9)   ;;  %v803_v2 = vmov (!%p190_p9), 0   ;;  %v232_v18 = vlaneseq (!%p190_p9) }
   0xe   : > { %193 = sbr.rel (%p190_p9) target bundleno = 702 (0x2be), region = 40  ;;  %328 = vmatprep.mubr.bf16.mxu0 (!%p190_p9), %v803_v2  ;;  %296 = vmatprep.subr.bf16.mxu0 (!%p190_p9), %v719_v0  ;;  %v722_v3 = vld [vmem:[%s992_s1 + $0x24] ss:$16 sps:$4 sm:$0xff] (!%p190_p9)   ;;  %v724_v4 = vld [vmem:[%s992_s1 + $0x20] ss:$16 sps:$4 sm:$0xff] (!%p190_p9)   ;;  %vm292_vm0 = vcmask (!%p190_p9), 261120  }
   0xf   : > { %297 = vmatpush1.bf16.msra.mxu0 (!%p190_p9), %v721_v1  ;;  %v727_v5 = vld [vmem:[%s992_s1 + $0xc] ss:$16 sps:$4 sm:$0xff] (!%p190_p9)   ;;  %v725_v6 = vld [vmem:[%s992_s1 + $0x8] ss:$16 sps:$4 sm:$0xff] (!%p190_p9)   ;;  %v804_v10 = vmov (!%p190_p9), 0.0   ;;  %vm805_vm1 = vmmov (!%p190_p9), 0  }
  0x10   : > { %298 = vmatprep.subr.bf16.mxu0 (!%p190_p9), %v722_v3  ;;  %v730_v8 = vld [vmem:[%s992_s1 + $0x2c] ss:$16 sps:$4 sm:$0xff] (!%p190_p9)   ;;  %v728_v9 = vld [vmem:[%s992_s1 + $0x28] ss:$16 sps:$4 sm:$0xff] (!%p190_p9)   ;;  %657 = vmatprep.subr.bf16.mxu1 (!%p190_p9), %v804_v10  ;;  %v731_v11 = vld [vmem:[%s995_s4] sm:$0xff] (!%p190_p9)   ;;  %v233_v19 = vshrl.u32 (!%p190_p9), %v232_v18, 7 }
  0x11   : > { %673 = vmatprep.mubr.msk.bf16.mxu1 (!%p190_p9), %vm805_vm1, %v804_v10  ;;  %658 = vmatpush3.bf16.msra.mxu1 (!%p190_p9), %v731_v11  ;;  %v732_v12 = vld [vmem:[%s995_s4 + $0x8] sm:$0xff] (!%p190_p9)   ;;  %v733_v13 = vld [vmem:[%s995_s4 + $0x10] sm:$0xff] (!%p190_p9)   ;;  %v734_v14 = vld [vmem:[%s995_s4 + $0x18] sm:$0xff] (!%p190_p9)   ;;  %vm385_vm2 = vcmask (!%p190_p9), 1043456   ;;  %vm381_vm3 = vcmask (!%p190_p9), 64512   ;;  %s637_s16 = sshll.u32 (!%p190_p9), %s858_s22, 6 }
  0x12   : > { %659 = vmatprep.subr.bf16.mxu1 (!%p190_p9), %v804_v10  ;;  %v735_v15 = vld [vmem:[%s995_s4 + $0x20] sm:$0xff] (!%p190_p9)   ;;  %v736_v16 = vld [vmem:[%s995_s4 + $0x28] sm:$0xff] (!%p190_p9)   ;;  %v737_v17 = vld [vmem:[%s995_s4 + $0x30] sm:$0xff] (!%p190_p9)   ;;  %v238_v21 = vsub.s32 (!%p190_p9), 1, %v233_v19  ;;  %v242_v23 = vsub.s32 (!%p190_p9), 2, %v233_v19  ;;  %v234_v40 = vsub.s32 (!%p190_p9), 0, %v233_v19  ;;  %s949_s30 = scalar_lea.hbm (!%p190_p9), %s996_s5, %s637_s16 }
  0x13   : > { %299 = vmatpush1.bf16.msra.mxu0 (!%p190_p9), %v724_v4  ;;  %v230_v24 = vld [vmem:[%s993_s2] sm:$0xf] (!%p190_p9)  ;;  %v738_v39 = vld [vmem:[%s995_s4 + $0x38] sm:$0xff] (!%p190_p9)   ;;  %v246_v49 = vsub.s32 (!%p190_p9), 3, %v233_v19  ;;  %s806_s7 = smov (!%p190_p9), [#allocation2]  }
  0x14   : > { %337 = vmatprep.subr.bf16.mxu0 (!%p190_p9), %v727_v5  ;;  %v239_v27 = vrot.slane (!%p190_p9), %v230_v24, %v238_v21  ;;  %v243_v28 = vrot.slane (!%p190_p9), %v230_v24, %v242_v23  ;;  %v380_v38 = vld [vmem:[%s994_s3] sm:$0xf] (!%p190_p9)  ;;  %v235_v41 = vrot.slane (!%p190_p9), %v230_v24, %v234_v40  ;;  %s743_s8 = sshll.u32 (!%p190_p9), %s806_s7, 4  ;;  %s744_s8 = int_to_ptr.vmem [resolvable:$false] %s743_s8 }
  0x15   : > { %s217_s11 = scalar_select %p216_p10, %s858_s22, 1  ;;  %660 = vmatpush3.bf16.msra.mxu1 %v732_v12  ;;  %v247_v50 = vrot.slane %v230_v24, %v246_v49 }
  0x16   : > { %661 = vmatprep.subr.bf16.mxu1 %v804_v10  ;;  %s745_s9 = scalar_lea.vmem %s744_s8, 128 }
  0x17   : > { %s616_s14 = sshll.u32 %s217_s11, 2 }
  0x18   : > { %s219_s25 = scalar_lea.vmem %s991_s0, %s616_s14  ;;  %s213_s14 = sand.u32 1, %s793_s19  }
  0x19   : > { %v221_v7 = vld [vmem:[%s219_s25] sm:$0xf]  ;;  %662 = vmatpush3.bf16.msra.mxu1 %v733_v13  ;;  %s615_s15 = sshll.u32 %s213_s14, 2  ;;  %s539_s6 = scalar_lea.sflag [#allocation3], %s213_s14 }
  0x1a   : > { %625 = vmatmul.mubr.msk.bf16.vlgmr.msra.gmra.mrb[0].mxu0 %vm292_vm0, %v221_v7  ;;  %663 = vmatprep.subr.bf16.mxu1 %v804_v10  ;;  %s215_s17 = scalar_lea.vmem [#allocation2], %s615_s15 }
  0x1b   : > { %338 = vmatpush1.bf16.msra.mxu0 %v725_v6  ;;  %369 = vmatprep.mubr.bf16.mxu0 %v803_v2  ;;  %s552_s23 = sshll.u32 %s215_s17, 4  ;;  %s951_s23 = int_to_ptr.vmem [resolvable:$true] %s552_s23 }
  0x1c   : > { %339 = vmatprep.subr.bf16.mxu0 %v730_v8  ;;  %s739_s22 = scalar_lea.vmem %s951_s23, 64  ;;  %p746_p0 = scmp.lt.s32.totalorder %s951_s23, %s744_s8 }
  0x1d   : > { %664 = vmatpush3.bf16.msra.mxu1 %v734_v14  ;;  %p740_p11 = scmp.ne.s32.totalorder %s951_s23, %s739_s22  ;;  %p747_p1 = scmp.lt.s32.totalorder %s745_s9, %s739_s22 }
  0x1e   : > { %665 = vmatprep.subr.bf16.mxu1 %v804_v10 }
  0x1f   : > { %340 = vmatpush1.bf16.msra.mxu0 %v728_v9  ;;  %p741_p12 = pnand %p740_p11, %p875_p5  ;;  %p748_p2 = por %p747_p1, %p746_p0 }
  0x20   : > { %651 = vmatprep.subr.bf16.mxu0 %v804_v10 }
  0x21   : > { %666 = vmatpush3.bf16.msra.mxu1 %v735_v15  ;;  %p742_p13 = pneg %p741_p12 }
  0x22   : > { %626 = vmatmul.mubr.msk.bf16.vlgmr.msra.gmra.mrb[4].mxu0 %vm292_vm0, %v221_v7  ;;  %667 = vmatprep.subr.bf16.mxu1 %v804_v10 }
  0x23   : > { %653 = vmatprep.mubr.msk.bf16.mxu0 %vm805_vm1, %v804_v10  ;;  %p749_p3 = pnand %p748_p2, %p742_p13 }
  0x25   : > { %668 = vmatpush3.bf16.msra.mxu1 %v736_v16 }
  0x26   : > { %669 = vmatprep.subr.bf16.mxu1 %v804_v10 }
  0x29   : > { %670 = vmatpush3.bf16.msra.mxu1 %v737_v17 }
  0x2a   : > { %671 = vmatprep.subr.bf16.mxu1 %v804_v10 }
  0x2d   : > { %672 = vmatpush3.bf16.msra.mxu1 %v738_v39 }
  0xed   : > { %v330_v20 = vpop.f32.mrb[0].mxu0 }
  0xee   : > { %v332_v22 = vpop.f32.mrb[1].mxu0  ;;  %v331_v42 = vadd.f32 %v330_v20, %v235_v41 }
  0xef   : > { %v334_v25 = vpop.f32.mrb[2].mxu0  ;;  %v333_v30 = vadd.f32 %v332_v22, %v239_v27 }
  0xf0   : > { %v335_v26 = vpop.f32.mrb[3].mxu0 }
  0xf5   : > { %v371_v29 = vpop.f32.mrb[4].mxu0 }
  0xf6   : > { %v372_v31 = vadd.f32 %v371_v29, %v243_v28  ;;  %v373_v32 = vpop.f32.mrb[5].mxu0 }
  0xf7   : > { %v375_v33 = vpop.f32.mrb[6].mxu0  ;;  %v374_v51 = vadd.f32 %v373_v32, %v247_v50 }
  0xf8   : > { %v378_v34 = vmul.f32 %v372_v31, %v333_v30  ;;  %v376_v35 = vpop.f32.mrb[7].mxu0 }
  0xfa   : > { %v379_v36 = vpack.c.bf16 %v378_v34, %v378_v34 }
  0xfc   : > { %v387_v37 = vsel %vm385_vm2, %v379_v36, 0 }
  0xfd   : > { %652 = vmatpush3.bf16.msra.mxu0 %v387_v37 }
 0x100   : > { %654 = vmatmul.mubr.msk.bf16.vlgmr.msra.gmra.mrb[8].mxu0 %vm381_vm3, %v380_v38 }
 0x1d3   : > { %v423_v43 = vpop.f32.mrb[8].mxu0 }
 0x1d4   : > { %v429_v44 = vmul.f32 %v423_v43, %v331_v42  ;;  %v655_v45 = vpop.f32.mrb[9].mxu0 }
 0x1d5   : > { %v426_v46 = vpop.f32.mrb[10].mxu0 }
 0x1d6   : > { %v430_v47 = vpack.c.bf16 %v429_v44, %v429_v44  ;;  %v656_v48 = vpop.f32.mrb[11].mxu0 }
 0x1d8   : > { %674 = vmatmul.mubr.bf16.vlgmr.msra.gmra.mrb[0].mxu1 %v430_v47 }
 0x2ab   : > { %v529_v52 = vpop.f32.mrb[0].mxu1 }
 0x2ac   : > { %v535_v53 = vadd.f32 %v529_v52, %v374_v51  ;;  %v675_v54 = vpop.f32.mrb[1].mxu1 }
 0x2ad   : > { %v532_v55 = vpop.f32.mrb[2].mxu1 }
 0x2ae   : > { %v536_v56 = vpack.c.bf16 %v535_v53, %v535_v53  ;;  %v676_v57 = vpop.f32.mrb[3].mxu1 }
 0x2b0   : > { %537 = vst [vmem:[%s215_s17] sm:$0xf] %v536_v56 }
 0x2b1   : > { %752 = shalt.err (!%p749_p3)
}
 0x2b2   : > { %s753_s10 = scalar_lea.hbm %s949_s30, 64  ;;  %s757_s13 = scalar_lea.hbm %s996_s5, 128 }
 0x2b3   : > { %p754_p4 = scmp.ne.s32.totalorder %s949_s30, %s753_s10  ;;  %p758_p9 = scmp.lt.u32.totalorder %s949_s30, %s996_s5 }
 0x2b4   : > { %p759_p10 = scmp.lt.u32.totalorder %s757_s13, %s753_s10  ;;  %p761_p12 = scmp.lt.u32.totalorder %s753_s10, %s949_s30 }
 0x2b5   : > { %p755_p7 = pnand %p754_p4, %p875_p5 }
 0x2b6   : > { %p760_p11 = por %p759_p10, %p758_p9 }
 0x2b7   : > { %p756_p8 = pneg %p755_p7 }
 0x2b8   : > { %p762_p13 = por %p761_p12, %p760_p11 }
 0x2ba   : > { %p763_p0 = pnand %p762_p13, %p756_p8 }
 0x2bc   : > { %766 = shalt.err (!%p763_p0)
}
 0x2bd   : > { %677 = dma.vmem_to_hbm [thread:$0]  (%p875_p5), %s951_s23, 64, %s949_s30, %s539_s6  }
 0x2be PF: > { %p683_p1 = scmp.ge.s32.totalorder %s801_s21, 2  ;;  %s564_s16 = sand.u32 1, %s789_s18  }
 0x2bf   : > { %s565_s17 = scalar_lea.sflag [#allocation3], %s564_s16 }
 0x2c0   : > { %p680_p2 = pnand %p683_p1, %p879_p6 }
 0x2c2   : > { %784 = dma.done.wait (!%p680_p2), %s565_s17, 64  }
 0x2c3   : > { %786 = vsyncadd (!%p680_p2), %s565_s17, 4294967232  ;;  %p15_p3 = scmp.ge.s32.totalorder %s862_s24, 4   ;;  %s999_s18 = smov %s793_s19 }
 0x2c4   : > { %s1000_s19 = smov %s797_s20  ;;  %s1001_s20 = smov %s873_s27 }
 0x2c5   : > { %s1002_s21 = smov %s862_s24  ;;  %17 = sbr.rel (!%p15_p3) target bundleno = 3 (0x3), region = 75 }
 0x2cc   :  { %570 = vsyncpa [#allocation3], 1 }
 0x2cd   :  { %572 = vsyncpa [#allocation3 + $0x1], 1 }

</bundles_post_ra>
